<compile_context>
chip_gen: v7x
topology: tpu7x:2x2x1
jax: 0.10.0
libtpu: 0.0.40
codegen_flags: <defaults>
</compile_context>

<pallas_src>
import functools

import numpy as np
import jax
import jax.numpy as jnp
from jax.experimental import pallas as pl
from jax.experimental.pallas import tpu as pltpu

LN_EPS = 1e-5  # torch.nn.LayerNorm default


def _layernorm_onepass(h, gamma, beta):
    """One-pass LayerNorm: var = E[x^2] - E[x]^2 (both reductions independent)."""
    m = jnp.mean(h, axis=-1, keepdims=True)
    m2 = jnp.mean(h * h, axis=-1, keepdims=True)
    var = m2 - m * m
    return (h - m) * jax.lax.rsqrt(var + LN_EPS) * gamma + beta


def critic_kernel(x_ref, wcat_ref, bcat_ref, ln_in_ref, wh_ref, vh_ref,
                  out_ref, *, hl_one):
    # ---- fused state/action linear: [s|a] @ blockdiag(W_in, W_a) + [b_in|b_a]
    z = jnp.dot(x_ref[...], wcat_ref[...],
                preferred_element_type=jnp.float32) + bcat_ref[...]
    h1_pre = z[:, :hl_one]        # state branch, pre-LayerNorm
    av = z[:, hl_one:]            # action branch (bias already applied)

    # ---- input LayerNorm + relu ---------------------------------------------
    h1 = _layernorm_onepass(h1_pre, ln_in_ref[0:1, :], ln_in_ref[1:2, :])
    h1 = jnp.maximum(h1, 0.0)

    # ---- hidden linear + LayerNorm ------------------------------------------
    h2 = jnp.dot(h1, wh_ref[...],
                 preferred_element_type=jnp.float32) + vh_ref[0:1, :]
    h2 = _layernorm_onepass(h2, vh_ref[1:2, :], vh_ref[2:3, :])

    # ---- combine + critic head (VPU mul + lane reduction instead of N=1 MXU)
    sa = jnp.maximum(h2 + av, 0.0)
    q = jnp.sum(sa * vh_ref[3:4, :], axis=-1, keepdims=True) + vh_ref[4:5, 0:1]
    out_ref[...] = q


def pack_params(p):
    """One-time parameter transform: block-diag fused weight + packed vectors."""
    d_in, hl_one = p["w_in"].shape
    n_actions, hl_two = p["w_a"].shape

    w_cat = jnp.zeros((d_in + n_actions, hl_one + hl_two), jnp.float32)
    w_cat = w_cat.at[:d_in, :hl_one].set(p["w_in"])
    w_cat = w_cat.at[d_in:, hl_one:].set(p["w_a"])
    b_cat = jnp.concatenate([p["b_in"], p["b_a"]], axis=1)          # (1, H1+H2)

    ln_in = jnp.concatenate([p["g_in"], p["be_in"]], axis=0)        # (2, H1)

    w_c_row = p["w_c"].reshape(1, hl_two)
    b_c_row = jnp.full((1, hl_two), p["b_c"][0, 0], jnp.float32)
    vecs_h = jnp.concatenate(
        [p["b_h"], p["g_h"], p["be_h"], w_c_row, b_c_row], axis=0)  # (5, H2)

    return {
        "w_cat": w_cat, "b_cat": b_cat, "ln_in": ln_in,
        "w_h": p["w_h"], "vecs_h": vecs_h,
        "d_in": d_in, "n_actions": n_actions,
        "hl_one": hl_one, "hl_two": hl_two,
    }


def critic_forward(state, action, packed, *, bm=None):
    """state: (B, *input_dims) f32; action: (B, n_actions) f32 -> (B, 1) f32."""
    B = state.shape[0]
    s_flat = state.reshape(B, -1).astype(jnp.float32)               # nn.Flatten()
    x_cat = jnp.concatenate([s_flat, action.astype(jnp.float32)], axis=1)
    d_cat = x_cat.shape[1]
    hl_one, hl_two = packed["hl_one"], packed["hl_two"]

    # Batch tile: multiple of 8 (sublane), capped at 256 (fills MXU M on v6e/v7x).
    b_pad8 = -(-B // 8) * 8
    if bm is None:
        bm = 256
    bm = max(8, min(bm, b_pad8))
    Bp = -(-B // bm) * bm
    if Bp != B:
        x_cat = jnp.pad(x_cat, ((0, Bp - B), (0, 0)))

    kern = functools.partial(critic_kernel, hl_one=hl_one)
    out = pl.pallas_call(
        kern,
        out_shape=jax.ShapeDtypeStruct((Bp, 1), jnp.float32),
        grid=(Bp // bm,),
        in_specs=[
            pl.BlockSpec((bm, d_cat), lambda i: (i, 0)),                 # x_cat
            pl.BlockSpec((d_cat, hl_one + hl_two), lambda i: (0, 0)),    # w_cat
            pl.BlockSpec((1, hl_one + hl_two), lambda i: (0, 0)),        # b_cat
            pl.BlockSpec((2, hl_one), lambda i: (0, 0)),                 # ln_in
            pl.BlockSpec((hl_one, hl_two), lambda i: (0, 0)),            # w_h
            pl.BlockSpec((5, hl_two), lambda i: (0, 0)),                 # vecs_h
        ],
        out_specs=pl.BlockSpec((bm, 1), lambda i: (i, 0)),
        compiler_params=pltpu.CompilerParams(
            dimension_semantics=("parallel",)),
    )(x_cat, packed["w_cat"], packed["b_cat"], packed["ln_in"],
      packed["w_h"], packed["vecs_h"])
    return out[:B]


def init_params(key, input_dims, n_actions, hl_one, hl_two):
    d_in = int(np.prod(input_dims))
    ks = jax.random.split(key, 8)

    def unif(k, shape, bound):
        return jax.random.uniform(k, shape, jnp.float32, -bound, bound)

    # PyTorch module uses 1/sqrt(weight.size()[0]) == 1/sqrt(out_features)
    f_in = 1.0 / np.sqrt(hl_one)
    f_h = 1.0 / np.sqrt(hl_two)
    f_a = 1.0 / np.sqrt(hl_two)
    f_c = 0.003

    return {
        # weights stored (in, out) for x @ W
        "w_in": unif(ks[0], (d_in, hl_one), f_in),
        "b_in": unif(ks[1], (1, hl_one), f_in),
        "g_in": jnp.ones((1, hl_one), jnp.float32),
        "be_in": jnp.zeros((1, hl_one), jnp.float32),
        "w_h": unif(ks[2], (hl_one, hl_two), f_h),
        "b_h": unif(ks[3], (1, hl_two), f_h),
        "g_h": jnp.ones((1, hl_two), jnp.float32),
        "be_h": jnp.zeros((1, hl_two), jnp.float32),
        "w_a": unif(ks[4], (n_actions, hl_two), f_a),
        "b_a": unif(ks[5], (1, hl_two), f_a),
        "w_c": unif(ks[6], (hl_two, 1), f_c),
        "b_c": unif(ks[7], (1, 1), f_c),
    }


def reference_forward(state, action, p):
    s = state.reshape(state.shape[0], -1)
    h1 = s @ p["w_in"] + p["b_in"]
    mu = h1.mean(-1, keepdims=True)
    var = ((h1 - mu) ** 2).mean(-1, keepdims=True)
    h1 = (h1 - mu) / jnp.sqrt(var + LN_EPS) * p["g_in"] + p["be_in"]
    h1 = jnp.maximum(h1, 0.0)
    h2 = h1 @ p["w_h"] + p["b_h"]
    mu = h2.mean(-1, keepdims=True)
    var = ((h2 - mu) ** 2).mean(-1, keepdims=True)
    h2 = (h2 - mu) / jnp.sqrt(var + LN_EPS) * p["g_h"] + p["be_h"]
    av = action @ p["w_a"] + p["b_a"]
    sa = jnp.maximum(h2 + av, 0.0)
    return sa @ p["w_c"] + p["b_c"]


if __name__ == "__main__":
    # LunarLanderContinuous-like dims: obs=8, actions=2; hidden layers 128/128.
    input_dims = (8,)
    n_actions = 2
    hl_one, hl_two = 128, 128
    batch = 8

    key = jax.random.PRNGKey(0)
    kp, ks, ka = jax.random.split(key, 3)
    params = init_params(kp, input_dims, n_actions, hl_one, hl_two)
    packed = pack_params(params)
    state = jax.random.normal(ks, (batch,) + input_dims, jnp.float32)
    action = jax.random.normal(ka, (batch, n_actions), jnp.float32)

    out = critic_forward(state, action, packed)
    out = jax.block_until_ready(out)

    ref = reference_forward(state, action, params)
    np.testing.assert_allclose(np.asarray(out), np.asarray(ref),
                               rtol=1e-5, atol=1e-5)
    print("KERNEL_OK")
</pallas_src>

<mosaic_0001>
module attributes {stable_mosaic.version = 11 : i64} {
  func.func @critic_kernel(%arg0: i32, %arg1: memref<8x10xf32, #tpu.memory_space<vmem>>, %arg2: memref<10x256xf32, #tpu.memory_space<vmem>>, %arg3: memref<1x256xf32, #tpu.memory_space<vmem>>, %arg4: memref<2x128xf32, #tpu.memory_space<vmem>>, %arg5: memref<128x128xf32, #tpu.memory_space<vmem>>, %arg6: memref<5x128xf32, #tpu.memory_space<vmem>>, %arg7: memref<8x1xf32, #tpu.memory_space<vmem>>) attributes {dimension_semantics = [#tpu.dimension_semantics<parallel>], iteration_bounds = array<i64: 1>, scalar_prefetch = 0 : i64, scratch_operands = 0 : i64, tpu.core_type = #tpu.core_type<tc>, window_params = [{transform_indices = @transform_0, window_bounds = array<i64: 8, 10>}, {pipeline_mode = #tpu.pipeline_mode<synchronous>, transform_indices = @transform_1, window_bounds = array<i64: 10, 256>}, {pipeline_mode = #tpu.pipeline_mode<synchronous>, transform_indices = @transform_2, window_bounds = array<i64: 1, 256>}, {pipeline_mode = #tpu.pipeline_mode<synchronous>, transform_indices = @transform_3, window_bounds = array<i64: 2, 128>}, {pipeline_mode = #tpu.pipeline_mode<synchronous>, transform_indices = @transform_4, window_bounds = array<i64: 128, 128>}, {pipeline_mode = #tpu.pipeline_mode<synchronous>, transform_indices = @transform_5, window_bounds = array<i64: 5, 128>}, {transform_indices = @transform_6, window_bounds = array<i64: 8, 1>}]} {
    %c0 = arith.constant 0 : index
    %c0_0 = arith.constant 0 : index
    %0 = vector.load %arg1[%c0, %c0_0] : memref<8x10xf32, #tpu.memory_space<vmem>>, vector<8x10xf32>
    %c0_1 = arith.constant 0 : index
    %c0_2 = arith.constant 0 : index
    %1 = vector.load %arg2[%c0_1, %c0_2] : memref<10x256xf32, #tpu.memory_space<vmem>>, vector<10x256xf32>
    %cst = arith.constant dense<0.000000e+00> : vector<8x256xf32>
    %2 = tpu.matmul %0, %1, %cst {dimension_numbers = #tpu.dot_dimension_numbers<[1], [0], [0], [1], [0, 0, 1, 1], [], []>} : vector<8x10xf32>, vector<10x256xf32>, vector<8x256xf32> -> vector<8x256xf32>
    %c0_3 = arith.constant 0 : index
    %c0_4 = arith.constant 0 : index
    %3 = vector.load %arg3[%c0_3, %c0_4] : memref<1x256xf32, #tpu.memory_space<vmem>>, vector<1x256xf32>
    %4 = vector.broadcast %3 : vector<1x256xf32> to vector<8x256xf32>
    %5 = arith.addf %2, %4 : vector<8x256xf32>
    %6 = vector.extract_strided_slice %5 {offsets = [0, 0], sizes = [8, 128], strides = [1, 1]} : vector<8x256xf32> to vector<8x128xf32>
    %7 = vector.extract_strided_slice %5 {offsets = [0, 128], sizes = [8, 128], strides = [1, 1]} : vector<8x256xf32> to vector<8x128xf32>
    %c0_5 = arith.constant 0 : index
    %c0_6 = arith.constant 0 : index
    %8 = vector.load %arg4[%c0_5, %c0_6] : memref<2x128xf32, #tpu.memory_space<vmem>>, vector<1x128xf32>
    %c1 = arith.constant 1 : index
    %c0_7 = arith.constant 0 : index
    %9 = vector.load %arg4[%c1, %c0_7] : memref<2x128xf32, #tpu.memory_space<vmem>>, vector<1x128xf32>
    %cst_8 = arith.constant dense<0.000000e+00> : vector<8xf32>
    %10 = vector.multi_reduction <add>, %6, %cst_8 [1] : vector<8x128xf32> to vector<8xf32>
    %11 = vector.shape_cast %10 : vector<8xf32> to vector<8x1xf32>
    %cst_9 = arith.constant 1.280000e+02 : f32
    %12 = vector.broadcast %cst_9 : f32 to vector<8x1xf32>
    %13 = arith.divf %11, %12 : vector<8x1xf32>
    %14 = arith.mulf %6, %6 : vector<8x128xf32>
    %cst_10 = arith.constant dense<0.000000e+00> : vector<8xf32>
    %15 = vector.multi_reduction <add>, %14, %cst_10 [1] : vector<8x128xf32> to vector<8xf32>
    %16 = vector.shape_cast %15 : vector<8xf32> to vector<8x1xf32>
    %cst_11 = arith.constant 1.280000e+02 : f32
    %17 = vector.broadcast %cst_11 : f32 to vector<8x1xf32>
    %18 = arith.divf %16, %17 : vector<8x1xf32>
    %19 = arith.mulf %13, %13 : vector<8x1xf32>
    %20 = arith.subf %18, %19 : vector<8x1xf32>
    %21 = vector.broadcast %13 : vector<8x1xf32> to vector<8x128xf32>
    %22 = arith.subf %6, %21 : vector<8x128xf32>
    %cst_12 = arith.constant 9.99999974E-6 : f32
    %23 = vector.broadcast %cst_12 : f32 to vector<8x1xf32>
    %24 = arith.addf %20, %23 : vector<8x1xf32>
    %25 = math.rsqrt %24 : vector<8x1xf32>
    %26 = vector.broadcast %25 : vector<8x1xf32> to vector<8x128xf32>
    %27 = arith.mulf %22, %26 : vector<8x128xf32>
    %28 = vector.broadcast %8 : vector<1x128xf32> to vector<8x128xf32>
    %29 = arith.mulf %27, %28 : vector<8x128xf32>
    %30 = vector.broadcast %9 : vector<1x128xf32> to vector<8x128xf32>
    %31 = arith.addf %29, %30 : vector<8x128xf32>
    %cst_13 = arith.constant 0.000000e+00 : f32
    %32 = vector.broadcast %cst_13 : f32 to vector<8x128xf32>
    %33 = arith.maximumf %31, %32 : vector<8x128xf32>
    %c0_14 = arith.constant 0 : index
    %c0_15 = arith.constant 0 : index
    %34 = vector.load %arg5[%c0_14, %c0_15] : memref<128x128xf32, #tpu.memory_space<vmem>>, vector<128x128xf32>
    %cst_16 = arith.constant dense<0.000000e+00> : vector<8x128xf32>
    %35 = tpu.matmul %33, %34, %cst_16 {dimension_numbers = #tpu.dot_dimension_numbers<[1], [0], [0], [1], [0, 0, 1, 1], [], []>} : vector<8x128xf32>, vector<128x128xf32>, vector<8x128xf32> -> vector<8x128xf32>
    %c0_17 = arith.constant 0 : index
    %c0_18 = arith.constant 0 : index
    %36 = vector.load %arg6[%c0_17, %c0_18] : memref<5x128xf32, #tpu.memory_space<vmem>>, vector<1x128xf32>
    %37 = vector.broadcast %36 : vector<1x128xf32> to vector<8x128xf32>
    %38 = arith.addf %35, %37 : vector<8x128xf32>
    %c1_19 = arith.constant 1 : index
    %c0_20 = arith.constant 0 : index
    %39 = vector.load %arg6[%c1_19, %c0_20] : memref<5x128xf32, #tpu.memory_space<vmem>>, vector<1x128xf32>
    %c2 = arith.constant 2 : index
    %c0_21 = arith.constant 0 : index
    %40 = vector.load %arg6[%c2, %c0_21] : memref<5x128xf32, #tpu.memory_space<vmem>>, vector<1x128xf32>
    %cst_22 = arith.constant dense<0.000000e+00> : vector<8xf32>
    %41 = vector.multi_reduction <add>, %38, %cst_22 [1] : vector<8x128xf32> to vector<8xf32>
    %42 = vector.shape_cast %41 : vector<8xf32> to vector<8x1xf32>
    %cst_23 = arith.constant 1.280000e+02 : f32
    %43 = vector.broadcast %cst_23 : f32 to vector<8x1xf32>
    %44 = arith.divf %42, %43 : vector<8x1xf32>
    %45 = arith.mulf %38, %38 : vector<8x128xf32>
    %cst_24 = arith.constant dense<0.000000e+00> : vector<8xf32>
    %46 = vector.multi_reduction <add>, %45, %cst_24 [1] : vector<8x128xf32> to vector<8xf32>
    %47 = vector.shape_cast %46 : vector<8xf32> to vector<8x1xf32>
    %cst_25 = arith.constant 1.280000e+02 : f32
    %48 = vector.broadcast %cst_25 : f32 to vector<8x1xf32>
    %49 = arith.divf %47, %48 : vector<8x1xf32>
    %50 = arith.mulf %44, %44 : vector<8x1xf32>
    %51 = arith.subf %49, %50 : vector<8x1xf32>
    %52 = vector.broadcast %44 : vector<8x1xf32> to vector<8x128xf32>
    %53 = arith.subf %38, %52 : vector<8x128xf32>
    %cst_26 = arith.constant 9.99999974E-6 : f32
    %54 = vector.broadcast %cst_26 : f32 to vector<8x1xf32>
    %55 = arith.addf %51, %54 : vector<8x1xf32>
    %56 = math.rsqrt %55 : vector<8x1xf32>
    %57 = vector.broadcast %56 : vector<8x1xf32> to vector<8x128xf32>
    %58 = arith.mulf %53, %57 : vector<8x128xf32>
    %59 = vector.broadcast %39 : vector<1x128xf32> to vector<8x128xf32>
    %60 = arith.mulf %58, %59 : vector<8x128xf32>
    %61 = vector.broadcast %40 : vector<1x128xf32> to vector<8x128xf32>
    %62 = arith.addf %60, %61 : vector<8x128xf32>
    %63 = arith.addf %62, %7 : vector<8x128xf32>
    %cst_27 = arith.constant 0.000000e+00 : f32
    %64 = vector.broadcast %cst_27 : f32 to vector<8x128xf32>
    %65 = arith.maximumf %63, %64 : vector<8x128xf32>
    %c3 = arith.constant 3 : index
    %c0_28 = arith.constant 0 : index
    %66 = vector.load %arg6[%c3, %c0_28] : memref<5x128xf32, #tpu.memory_space<vmem>>, vector<1x128xf32>
    %67 = vector.broadcast %66 : vector<1x128xf32> to vector<8x128xf32>
    %68 = arith.mulf %65, %67 : vector<8x128xf32>
    %cst_29 = arith.constant dense<0.000000e+00> : vector<8xf32>
    %69 = vector.multi_reduction <add>, %68, %cst_29 [1] : vector<8x128xf32> to vector<8xf32>
    %70 = vector.shape_cast %69 : vector<8xf32> to vector<8x1xf32>
    %c4 = arith.constant 4 : index
    %c0_30 = arith.constant 0 : index
    %71 = vector.load %arg6[%c4, %c0_30] : memref<5x128xf32, #tpu.memory_space<vmem>>, vector<1x1xf32>
    %72 = vector.broadcast %71 : vector<1x1xf32> to vector<8x1xf32>
    %73 = arith.addf %70, %72 : vector<8x1xf32>
    %c0_31 = arith.constant 0 : index
    %c0_32 = arith.constant 0 : index
    %74 = vector.load %arg7[%c0_31, %c0_32] : memref<8x1xf32, #tpu.memory_space<vmem>>, vector<8x1xf32>
    tpu.vector_store %arg7[%c0_31, %c0_32], %73 {strides = array<i32>} : memref<8x1xf32, #tpu.memory_space<vmem>>, vector<8x1xf32>,
    return
  }
  func.func @transform_0(%arg0: i32) -> (i32, i32) {
    %c0_i32 = arith.constant 0 : i32
    %c0_i32_0 = arith.constant 0 : i32
    return %arg0, %c0_i32 : i32, i32
  }
  func.func @transform_1(%arg0: i32) -> (i32, i32) {
    %c0_i32 = arith.constant 0 : i32
    %c0_i32_0 = arith.constant 0 : i32
    %c0_i32_1 = arith.constant 0 : i32
    return %c0_i32, %c0_i32_0 : i32, i32
  }
  func.func @transform_2(%arg0: i32) -> (i32, i32) {
    %c0_i32 = arith.constant 0 : i32
    %c0_i32_0 = arith.constant 0 : i32
    %c0_i32_1 = arith.constant 0 : i32
    return %c0_i32, %c0_i32_0 : i32, i32
  }
  func.func @transform_3(%arg0: i32) -> (i32, i32) {
    %c0_i32 = arith.constant 0 : i32
    %c0_i32_0 = arith.constant 0 : i32
    %c0_i32_1 = arith.constant 0 : i32
    return %c0_i32, %c0_i32_0 : i32, i32
  }
  func.func @transform_4(%arg0: i32) -> (i32, i32) {
    %c0_i32 = arith.constant 0 : i32
    %c0_i32_0 = arith.constant 0 : i32
    %c0_i32_1 = arith.constant 0 : i32
    return %c0_i32, %c0_i32_0 : i32, i32
  }
  func.func @transform_5(%arg0: i32) -> (i32, i32) {
    %c0_i32 = arith.constant 0 : i32
    %c0_i32_0 = arith.constant 0 : i32
    %c0_i32_1 = arith.constant 0 : i32
    return %c0_i32, %c0_i32_0 : i32, i32
  }
  func.func @transform_6(%arg0: i32) -> (i32, i32) {
    %c0_i32 = arith.constant 0 : i32
    %c0_i32_0 = arith.constant 0 : i32
    return %arg0, %c0_i32 : i32, i32
  }
}

</mosaic_0001>

<bundles_post_ra>
// kernel: tpu_custom_call.1
= control target key start
LH: loop header
LB: loop body
LE: loop exit
PB: predicated region body
PF: predicated region fallthrough
CT: control target
= control target key end

     0   :  { %11 = vsyncpa [#allocation3], 0  ;;  %s625_s0 = inlined_call_operand.hbm [shape: f32[8,10], index: 0, kind: input, shape index: {}]   ;;  %s626_s1 = inlined_call_operand.hbm [shape: f32[10,256], index: 1, kind: input, shape index: {}]   ;;  %s627_s2 = inlined_call_operand.vmem [shape: f32[1,256], index: 2, kind: input, shape index: {}]   ;;  %s628_s3 = inlined_call_operand.vmem [shape: f32[2,128], index: 3, kind: input, shape index: {}]   ;;  %s629_s4 = inlined_call_operand.hbm [shape: f32[128,128], index: 4, kind: input, shape index: {}]   ;;  %s630_s5 = inlined_call_operand.vmem [shape: f32[5,128], index: 5, kind: input, shape index: {}]   ;;  %s631_s6 = inlined_call_operand.vmem [shape: f32[8,1], index: 6, kind: output, shape index: {}]  }
   0x1   :  { %12 = vsyncpa [#allocation5], 0  ;;  %s505_s21 = smov [#allocation4]   ;;  %s435_s25 = scalar_lea.hbm %s626_s1, 512 }
   0x2   :  { %s28_s22 = sshll.u32 %s505_s21, 4  ;;  %p436_p0 = scmp.ne.s32.totalorder %s626_s1, %s435_s25  ;;  %s29_s22 = int_to_ptr.vmem [resolvable:$true] %s28_s22 }
   0x3   :  { %p439_p1 = scmp.lt.u32.totalorder %s435_s25, %s626_s1 }
   0x5   :  { %p441_p2 = pnand %p439_p1, %p436_p0 }
   0x7   :  { %444 = shalt.err (!%p441_p2)
}
   0x8   :  { %s445_s30 = scalar_lea.vmem %s29_s22, 512  ;;  %p450_p4 = scmp.lt.s32.totalorder %s29_s22, %s29_s22 }
   0x9   :  { %p446_p3 = scmp.ne.s32.totalorder %s29_s22, %s445_s30  ;;  %p451_p5 = scmp.lt.s32.totalorder %s445_s30, %s445_s30 }
   0xb   :  { %p452_p6 = por %p451_p5, %p450_p4 }
   0xd   :  { %p453_p7 = pnand %p452_p6, %p446_p3 }
   0xf   :  { %456 = shalt.err (!%p453_p7)
}
  0x10   :  { %s506_s7 = smov 256   ;;  %s507_s8 = smov 16  }
  0x11   :  { %34 = dma.hbm_to_vmem [thread:$0]  %s626_s1, 512, %s29_s22, [#allocation5], %s506_s7, %s506_s7, %s507_s8  }
  0x12   :  { %s508_s11 = smov [#allocation2]   ;;  %s509_s13 = smov [#allocation6]  }
  0x13   :  { %s19_s12 = sshll.u32 %s508_s11, 4  ;;  %s44_s14 = sshll.u32 %s509_s13, 4  ;;  %s20_s12 = int_to_ptr.vmem [resolvable:$true] %s19_s12  ;;  %s45_s14 = int_to_ptr.vmem [resolvable:$true] %s44_s14 }
  0x14   :  { %s457_s17 = scalar_lea.hbm %s625_s0, 128 }
  0x15   :  { %p458_p8 = scmp.ne.s32.totalorder %s625_s0, %s457_s17  ;;  %p461_p9 = scmp.lt.u32.totalorder %s457_s17, %s625_s0 }
  0x17   :  { %p463_p10 = pnand %p461_p9, %p458_p8 }
  0x19   :  { %466 = shalt.err (!%p463_p10)
}
  0x1a   :  { %s467_s1 = scalar_lea.vmem %s20_s12, 128  ;;  %p472_p12 = scmp.lt.s32.totalorder %s20_s12, %s20_s12 }
  0x1b   :  { %p468_p11 = scmp.ne.s32.totalorder %s20_s12, %s467_s1  ;;  %p473_p13 = scmp.lt.s32.totalorder %s467_s1, %s467_s1 }
  0x1d   :  { %p474_p0 = por %p473_p13, %p472_p12 }
  0x1f   :  { %p475_p1 = pnand %p474_p0, %p468_p11 }
  0x21   :  { %478 = shalt.err (!%p475_p1)
}
  0x22   :  { %22 = dma.hbm_to_vmem [thread:$0]  %s625_s0, 128, %s20_s12, [#allocation3]  }
  0x23   :  { %s479_s26 = scalar_lea.hbm %s629_s4, 2048 }
  0x24   :  { %p480_p2 = scmp.ne.s32.totalorder %s629_s4, %s479_s26  ;;  %p483_p3 = scmp.lt.u32.totalorder %s479_s26, %s629_s4 }
  0x26   :  { %p485_p4 = pnand %p483_p3, %p480_p2 }
  0x28   :  { %488 = shalt.err (!%p485_p4)
}
  0x29   :  { %s489_s7 = scalar_lea.vmem %s45_s14, 2048  ;;  %p494_p6 = scmp.lt.s32.totalorder %s45_s14, %s45_s14 }
  0x2a   :  { %p490_p5 = scmp.ne.s32.totalorder %s45_s14, %s489_s7  ;;  %p495_p7 = scmp.lt.s32.totalorder %s489_s7, %s489_s7 }
  0x2c   :  { %p496_p8 = por %p495_p7, %p494_p6 }
  0x2e   :  { %p497_p9 = pnand %p496_p8, %p490_p5 }
  0x30   :  { %500 = shalt.err (!%p497_p9)
}
  0x31   :  { %s510_s0 = smov 128   ;;  %s511_s8 = smov 8  }
  0x32   :  { %50 = dma.hbm_to_vmem [thread:$0]  %s629_s4, 2048, %s45_s14, [#allocation5], %s510_s0, %s510_s0, %s511_s8  }
  0x33   :  { %501 = dma.done.wait [#allocation3], 128  }
  0x34   :  { %502 = vsyncadd [#allocation3], 4294967168 }
  0x35   :  { %503 = dma.done.wait [#allocation5], 2560  }
  0x36   :  { %504 = vsyncadd [#allocation5], 4294964736  ;;  %v512_v0 = vmov 0.0   ;;  %vm83_vm0 = vcmask 1041408   ;;  %vm513_vm1 = vmmov 1   ;;  %v64_v1 = vld [vmem:[#allocation4 + $0x8] sm:$0xff]  ;;  %v69_v12 = vlaneseq }
  0x37   :  { %154 = vmatprep.mubr.f32.mxu0 %v512_v0  ;;  %vm391_vm2 = vmpackc.low %vm83_vm0, %vm513_vm1  ;;  %v66_v2 = vld [vmem:[#allocation4 + $0x18] sm:$0x3]  ;;  %v63_v3 = vld [vmem:[#allocation4] sm:$0xff]  ;;  %vm79_vm3 = vcmask 80896   ;;  %v514_v10 = vmov 0.0|0.0   ;;  %vm515_vm4 = vmmov 0  }
  0x38   :  { %v390_v4 = vpack.c.bf16 %v66_v2, %v64_v1  ;;  %v65_v5 = vld [vmem:[#allocation4 + $0x10] sm:$0x3]  ;;  %v62_v7 = vld [vmem:[#allocation2] sm:$0xff]  ;;  %v188_v8 = vld [vmem:[#allocation6] sm:$0xff]  ;;  %396 = vmatprep.subr.bf16.mxu1 %v514_v10  ;;  %v587_v13 = vshrl.u32 %v69_v12, 7  ;;  %387 = vmatprep.mubr.msk.f32.mxu1 %vm515_vm4, %v512_v0  ;;  %vm320_vm5 = vcmask 7168  }
  0x39   :  { %v393_v6 = vpack.c.bf16 %v65_v5, %v63_v3  ;;  %v189_v9 = vld [vmem:[#allocation6 + $0x8] sm:$0xff]  ;;  %v593_v15 = vld [vmem:[%s627_s2] sm:$0x3]  ;;  %v190_v21 = vld [vmem:[#allocation6 + $0x10] sm:$0xff] }
  0x3a   :  { %392 = vmatprep.subr.msk.bf16.mxu0 %vm391_vm2, %v390_v4  ;;  %v397_v11 = vpack.c.bf16 %v189_v9, %v188_v8  ;;  %v71_v14 = vsub.s32 0, %v587_v13  ;;  %v191_v22 = vld [vmem:[#allocation6 + $0x18] sm:$0xff]  ;;  %v192_v24 = vld [vmem:[#allocation6 + $0x20] sm:$0xff]  ;;  %v193_v25 = vld [vmem:[#allocation6 + $0x28] sm:$0xff]  ;;  %v75_v5 = vsub.s32 1, %v587_v13 }
  0x3b   :  { %395 = vmatpush1.bf16.msk.msra.mxu0 %vm391_vm2, %v393_v6  ;;  %v400_v23 = vpack.c.bf16 %v191_v22, %v190_v21  ;;  %v403_v26 = vpack.c.bf16 %v193_v25, %v192_v24  ;;  %v194_v27 = vld [vmem:[#allocation6 + $0x30] sm:$0xff]  ;;  %v195_v28 = vld [vmem:[#allocation6 + $0x38] sm:$0xff]  ;;  %v196_v30 = vld [vmem:[#allocation6 + $0x40] sm:$0xff] }
  0x3c   :  { %398 = vmatpush3.bf16.msra.mxu1 %v397_v11  ;;  %v72_v16 = vrot.slane %v593_v15, %v71_v14  ;;  %v406_v29 = vpack.c.bf16 %v195_v28, %v194_v27  ;;  %v197_v31 = vld [vmem:[#allocation6 + $0x48] sm:$0xff]  ;;  %v198_v33 = vld [vmem:[#allocation6 + $0x50] sm:$0xff]  ;;  %v199_v34 = vld [vmem:[#allocation6 + $0x58] sm:$0xff]  ;;  %v76_v9 = vrot.slane %v593_v15, %v75_v5 }
  0x3d   :  { %399 = vmatprep.subr.bf16.mxu1 %v514_v10  ;;  %v409_v32 = vpack.c.bf16 %v197_v31, %v196_v30  ;;  %v412_v35 = vpack.c.bf16 %v199_v34, %v198_v33  ;;  %v200_v36 = vld [vmem:[#allocation6 + $0x60] sm:$0xff]  ;;  %v201_v37 = vld [vmem:[#allocation6 + $0x68] sm:$0xff]  ;;  %v202_v39 = vld [vmem:[#allocation6 + $0x70] sm:$0xff] }
  0x3e   :  { %330 = vmatmul.mubr.msk.f32.vlgmr.msra.gmra.mrb[0].mxu0 %vm79_vm3, %v62_v7  ;;  %v415_v38 = vpack.c.bf16 %v201_v37, %v200_v36  ;;  %v203_v40 = vld [vmem:[#allocation6 + $0x78] sm:$0xff] }
  0x3f   :  { %v418_v41 = vpack.c.bf16 %v203_v40, %v202_v39  ;;  %v331_v51 = vld [vmem:[%s628_s3] ss:$0 sm:$0xff]  ;;  %v332_v53 = vld [vmem:[%s628_s3 + $0x1] ss:$0 sm:$0xff]  ;;  %v335_v11 = vld [vmem:[%s630_s5 + $0x2] ss:$0 sm:$0xff] }
  0x40   :  { %401 = vmatpush3.bf16.msra.mxu1 %v400_v23  ;;  %v333_v57 = vld [vmem:[%s630_s5] ss:$0 sm:$0xff]  ;;  %v334_v8 = vld [vmem:[%s630_s5 + $0x1] ss:$0 sm:$0xff]  ;;  %v336_v13 = vld [vmem:[%s630_s5 + $0x3] ss:$0 sm:$0xff] }
  0x41   :  { %402 = vmatprep.subr.bf16.mxu1 %v514_v10  ;;  %v337_v15 = vld [vmem:[%s630_s5 + $0x4] ss:$0 sm:$0xff] }
  0x44   :  { %404 = vmatpush3.bf16.msra.mxu1 %v403_v26 }
  0x45   :  { %405 = vmatprep.subr.bf16.mxu1 %v514_v10 }
  0x48   :  { %407 = vmatpush3.bf16.msra.mxu1 %v406_v29 }
  0x49   :  { %408 = vmatprep.subr.bf16.mxu1 %v514_v10 }
  0x4c   :  { %410 = vmatpush3.bf16.msra.mxu1 %v409_v32 }
  0x4d   :  { %411 = vmatprep.subr.bf16.mxu1 %v514_v10 }
  0x50   :  { %413 = vmatpush3.bf16.msra.mxu1 %v412_v35 }
  0x51   :  { %414 = vmatprep.subr.bf16.mxu1 %v514_v10 }
  0x54   :  { %416 = vmatpush3.bf16.msra.mxu1 %v415_v38 }
  0x55   :  { %417 = vmatprep.subr.bf16.mxu1 %v514_v10 }
  0x58   :  { %419 = vmatpush3.bf16.msra.mxu1 %v418_v41 }
 0x111   :  { %v156_v17 = vpop.f32.mrb[0].mxu0 }
 0x112   :  { %v157_v18 = vadd.f32 %v156_v17, %v72_v16  ;;  %v596_v19 = vpop.f32.mrb[1].mxu0 }
 0x113   :  { %v159_v14 = vadd.f32 %v596_v19, %v76_v9 }
 0x114   :  { %163 = vadd.xlane.f32.xlu0 %v157_v18  ;;  %v167_v20 = vmul.f32 %v157_v18, %v157_v18 }
 0x118   :  { %168 = vadd.xlane.f32.xlu0 %v167_v20 }
 0x1a1   :  { %v164_v42 = vpop.xlane.xlu0 %163 }
 0x1a2   :  { %v166_v43 = vmul.f32 0.0078125, %v164_v42 }
 0x1a4   :  { %v171_v45 = vmul.f32 %v166_v43, %v166_v43  ;;  %v173_v49 = vsub.f32 %v157_v18, %v166_v43 }
 0x1a5   :  { %v169_v44 = vpop.xlane.xlu0 %168 }
 0x1a6   :  { %v170_v46 = vmul.f32 0.0078125, %v169_v44 }
 0x1a8   :  { %v172_v47 = vsub.f32 %v170_v46, %v171_v45 }
 0x1aa   :  { %v174_v48 = vadd.f32 1e-05, %v172_v47 }
 0x1ac   :  { %431 = vrsqrt.f32 %v174_v48 }
 0x1b6   :  { %v432_v50 = vpop.eup %431 }
 0x1b7   :  { %v176_v52 = vmul.f32 %v432_v50, %v173_v49 }
 0x1b9   :  { %v181_v54 = vmul.f32 %v331_v51, %v176_v52 }
 0x1bb   :  { %v186_v55 = vadd.f32 %v332_v53, %v181_v54 }
 0x1bd   :  { %v187_v56 = vmax.f32 %v186_v55, 0.0 }
 0x1bf   :  { %388 = vmatmul.mubr.f32.vlgmr.msra.gmra.mrb[0].mxu1 %v187_v56 }
 0x292   :  { %v275_v58 = vpop.f32.mrb[0].mxu1 }
 0x293   :  { %v276_v59 = vadd.f32 %v333_v57, %v275_v58  ;;  %v389_v60 = vpop.f32.mrb[1].mxu1 }
 0x295   :  { %281 = vadd.xlane.f32.xlu1 %v276_v59  ;;  %v284_v61 = vmul.f32 %v276_v59, %v276_v59 }
 0x299   :  { %285 = vadd.xlane.f32.xlu1 %v284_v61 }
 0x322   :  { %v282_v62 = vpop.xlane.xlu1 %281 }
 0x323   :  { %v283_v63 = vmul.f32 0.0078125, %v282_v62 }
 0x325   :  { %v288_v1 = vmul.f32 %v283_v63, %v283_v63  ;;  %v290_v6 = vsub.f32 %v276_v59, %v283_v63 }
 0x326   :  { %v286_v0 = vpop.xlane.xlu1 %285 }
 0x327   :  { %v287_v2 = vmul.f32 0.0078125, %v286_v0 }
 0x329   :  { %v289_v3 = vsub.f32 %v287_v2, %v288_v1 }
 0x32b   :  { %v291_v4 = vadd.f32 1e-05, %v289_v3 }
 0x32d   :  { %433 = vrsqrt.f32 %v291_v4 }
 0x337   :  { %v434_v7 = vpop.eup %433 }
 0x338   :  { %v293_v10 = vmul.f32 %v434_v7, %v290_v6 }
 0x33a   :  { %v298_v12 = vmul.f32 %v334_v8, %v293_v10 }
 0x33c   :  { %v303_v16 = vadd.f32 %v335_v11, %v298_v12 }
 0x33e   :  { %v304_v17 = vadd.f32 %v303_v16, %v159_v14 }
 0x340   :  { %v305_v18 = vmax.f32 %v304_v17, 0.0 }
 0x342   :  { %v311_v20 = vmul.f32 %v336_v13, %v305_v18 }
 0x344   :  { %312 = vadd.xlane.f32.xlu0 %v311_v20 }
 0x3d1   :  { %v313_v21 = vpop.xlane.xlu0 %312 }
 0x3d2   :  { %v319_v22 = vadd.f32 %v337_v15, %v313_v21 }
 0x3d4   :  { %321 = vst.msk [vmem:[%s631_s6] sm:$0xff] %vm320_vm5, %v319_v22 }
 0x3d5   :  { %326 = vsyncpa [#allocation3], 1 }
 0x3d6   :  { %327 = vsyncpa [#allocation5], 1 }

</bundles_post_ra>
